<compile_context>
chip_gen: v5e
topology: v5e:2x2
jax: 0.10.0
libtpu: 0.0.40
codegen_flags: <defaults>
</compile_context>

<pallas_src>
import functools

import jax
import jax.numpy as jnp
from jax.experimental import pallas as pl
from jax.experimental.pallas import tpu as pltpu

_VMEM_LIMIT = 48 * 1024 * 1024   # <= v7x 64 MiB physical; fine on v5e/v6e


def _round_up(v, m):
    return ((v + m - 1) // m) * m


def _pick_tiles(nc, hw, itemsize, block_budget_bytes=4 * 1024 * 1024,
                lane_cap=2048):
    """Pick (R, T, nc_pad, hw_pad) for a (nc, hw) row-major array.

    T: multiple of 128 (lane-dense stores), capped so the unrolled in-kernel
       slab loop stays short (<= 16 slabs).
    R: multiple of 8 (full sublane occupancy even for small C) dividing nc_pad,
       sized so one block is ~block_budget_bytes.
    """
    nc_pad = _round_up(nc, 8)
    T = min(_round_up(hw, 128), lane_cap)
    hw_pad = _round_up(hw, T)
    r_cap = max(block_budget_bytes // (T * itemsize), 8)
    r_cap = min((r_cap // 8) * 8, nc_pad)
    R = 8
    cand = int(r_cap)
    while cand >= 8:
        if nc_pad % cand == 0:
            R = cand
            break
        cand -= 8
    return R, T, nc_pad, hw_pad


def _stats_kernel(x_ref, c_ref, acc_ref):
    """x_ref: (R, T) tile; c_ref: (R, 1) per-row center (running_mean);
    acc_ref: (2, R, 128) resident lane-wide accumulator [sum; sum_sq] of the
    centered values.  Only the lane grid axis (axis 1) revisits acc_ref."""
    @pl.when(pl.program_id(1) == 0)
    def _():
        acc_ref[...] = jnp.zeros_like(acc_ref)

    R, T = x_ref.shape
    # Hoist the lane-broadcast of the per-row center out of the slab loop.
    c = jnp.broadcast_to(c_ref[...].astype(jnp.float32), (R, 128))
    s = jnp.zeros((R, 128), jnp.float32)
    ss = jnp.zeros((R, 128), jnp.float32)
    # VALU-only accumulation over unrolled 128-lane slabs; the single XLU
    # (cross-lane) reduce is deferred to the XLA combine step.
    for k in range(T // 128):
        slab = x_ref[:, k * 128:(k + 1) * 128].astype(jnp.float32) - c
        s = s + slab
        ss = ss + slab * slab
    acc_ref[0, :, :] += s
    acc_ref[1, :, :] += ss


def _norm_kernel(x_ref, p_ref, o_ref):
    """x_ref/o_ref: (R, T); p_ref: (R, 2) = per-row [scale, shift] (fp32)."""
    p = p_ref[...]
    if o_ref.dtype == jnp.bfloat16:
        # v6e/v7x VALUs run bf16 natively; stay in bf16 (halves vreg/vld/vst).
        scale = p[:, 0:1].astype(jnp.bfloat16)
        shift = p[:, 1:2].astype(jnp.bfloat16)
        o_ref[...] = x_ref[...].astype(jnp.bfloat16) * scale + shift
    else:
        scale = p[:, 0:1]
        shift = p[:, 1:2]
        x = x_ref[...].astype(jnp.float32)
        o_ref[...] = (x * scale + shift).astype(o_ref.dtype)


@functools.partial(jax.jit, static_argnames=("eps",))
def ema_batchnorm2d(x, running_mean, running_var, weight, bias,
                    num_batches_tracked, eps=1e-5):
    """x: NCHW. Returns (y, new_running_mean, new_running_var, new_nbt)."""
    N, C, H, W = x.shape
    HW = H * W
    NC = N * C
    M = N * HW
    assert M > 1, "unbiased variance needs more than one element per channel"

    R, T, NC_pad, HW_pad = _pick_tiles(NC, HW, x.dtype.itemsize)
    grid = (NC_pad // R, HW_pad // T)

    # Free reshape of contiguous NCHW; row r corresponds to (n, c) = (r//C, r%C).
    x2 = x.reshape(NC, HW)
    if NC_pad != NC or HW_pad != HW:
        x2 = jnp.pad(x2, ((0, NC_pad - NC), (0, HW_pad - HW)))

    rm32 = running_mean.astype(jnp.float32)
    c_rows = jnp.tile(rm32, (N,))
    if NC_pad != NC:
        c_rows = jnp.pad(c_rows, (0, NC_pad - NC))
    c_rows = c_rows.reshape(NC_pad, 1)

    # ---- pass 1: per-row centered sum / sum-of-squares ----------------------
    sums = pl.pallas_call(
        _stats_kernel,
        out_shape=jax.ShapeDtypeStruct((2, NC_pad, 128), jnp.float32),
        grid_spec=pl.GridSpec(
            grid=grid,
            in_specs=[pl.BlockSpec((R, T), lambda i, j: (i, j)),
                      pl.BlockSpec((R, 1), lambda i, j: (i, 0))],
            out_specs=pl.BlockSpec((2, R, 128), lambda i, j: (0, i, 0)),
        ),
        compiler_params=pltpu.CompilerParams(
            dimension_semantics=("parallel", "arbitrary"),
            vmem_limit_bytes=_VMEM_LIMIT),
    )(x2, c_rows)

    # ---- tiny per-channel combine (XLA; f traced => no recompile/step) ------
    per_row = jnp.sum(sums, axis=2)                           # (2, NC_pad)
    per_ch = per_row[:, :NC].reshape(2, N, C).sum(axis=1)     # (2, C)
    s_k, ss_k = per_ch[0], per_ch[1]

    # Lane padding was zero-filled, i.e. contributed (0 - rm) per padded
    # element to the centered sums; remove that contribution analytically.
    n_pad = float(N * (HW_pad - HW))
    s_real = s_k + n_pad * rm32
    ss_real = ss_k - n_pad * rm32 * rm32

    inv_m = 1.0 / float(M)
    d = s_real * inv_m                       # batch_mean - running_mean
    mean = rm32 + d
    var_b = jnp.maximum(ss_real * inv_m - d * d, 0.0)
    var_u = var_b * (float(M) / float(M - 1))

    f = 1.0 / (jnp.asarray(num_batches_tracked).astype(jnp.float32) + 1.0)
    new_rm = (1.0 - f) * rm32 + f * mean
    new_rv = (1.0 - f) * running_var.astype(jnp.float32) + f * var_u

    scale = weight.astype(jnp.float32) * jax.lax.rsqrt(new_rv + eps)
    shift = bias.astype(jnp.float32) - new_rm * scale
    scale_rows = jnp.tile(scale, (N,))
    shift_rows = jnp.tile(shift, (N,))
    if NC_pad != NC:
        scale_rows = jnp.pad(scale_rows, (0, NC_pad - NC))
        shift_rows = jnp.pad(shift_rows, (0, NC_pad - NC))
    params = jnp.stack([scale_rows, shift_rows], axis=1)       # (NC_pad, 2)

    # ---- pass 2: y = x * scale + shift (parallel over both grid axes) -------
    y2 = pl.pallas_call(
        _norm_kernel,
        out_shape=jax.ShapeDtypeStruct((NC_pad, HW_pad), x.dtype),
        grid_spec=pl.GridSpec(
            grid=grid,
            in_specs=[pl.BlockSpec((R, T), lambda i, j: (i, j)),
                      pl.BlockSpec((R, 2), lambda i, j: (i, 0))],
            out_specs=pl.BlockSpec((R, T), lambda i, j: (i, j)),
        ),
        compiler_params=pltpu.CompilerParams(
            dimension_semantics=("parallel", "parallel"),
            vmem_limit_bytes=_VMEM_LIMIT),
    )(x2, params)

    y = y2[:NC, :HW].reshape(N, C, H, W)
    new_nbt = num_batches_tracked + 1
    return (y,
            new_rm.astype(running_mean.dtype),
            new_rv.astype(running_var.dtype),
            new_nbt)


def _reference(x, rm, rv, w, b, nbt, eps):
    """Pure-JAX reference of the same semantics."""
    m = x.shape[0] * x.shape[2] * x.shape[3]
    mean = jnp.mean(x, axis=(0, 2, 3))
    var_b = jnp.mean((x - mean[None, :, None, None]) ** 2, axis=(0, 2, 3))
    var_u = var_b * (m / (m - 1))
    f = 1.0 / (nbt + 1)
    new_rm = (1.0 - f) * rm + f * mean
    new_rv = (1.0 - f) * rv + f * var_u
    y = ((x - new_rm[None, :, None, None])
         / jnp.sqrt(new_rv[None, :, None, None] + eps)
         * w[None, :, None, None] + b[None, :, None, None])
    return y, new_rm, new_rv


if __name__ == "__main__":
    key = jax.random.PRNGKey(0)
    kx, kw, kb = jax.random.split(key, 3)

    N, C, H, W = 2, 4, 16, 16
    x = jax.random.normal(kx, (N, C, H, W), dtype=jnp.float32) * 2.0 + 0.5

    # BatchNorm2d(C) state right after reset_running_stats():
    running_mean = jnp.zeros((C,), jnp.float32)
    running_var = jnp.ones((C,), jnp.float32)
    num_batches_tracked = jnp.int32(0)
    # affine parameters (deterministic, nontrivial)
    weight = 1.0 + 0.1 * jax.random.normal(kw, (C,), dtype=jnp.float32)
    bias = 0.1 * jax.random.normal(kb, (C,), dtype=jnp.float32)
    eps = 1e-5

    y, new_rm, new_rv, new_nbt = ema_batchnorm2d(
        x, running_mean, running_var, weight, bias,
        num_batches_tracked, eps=eps)
    y = jax.block_until_ready(y)

    y_ref, rm_ref, rv_ref = _reference(x, running_mean, running_var,
                                       weight, bias, 0, eps)
    assert y.shape == x.shape and y.dtype == x.dtype
    assert jnp.allclose(y, y_ref, rtol=1e-5, atol=2e-5), "y mismatch vs reference"
    assert jnp.allclose(new_rm, rm_ref, rtol=1e-5, atol=1e-5), "running_mean mismatch"
    assert jnp.allclose(new_rv, rv_ref, rtol=1e-5, atol=1e-5), "running_var mismatch"
    assert int(new_nbt) == 1, "num_batches_tracked mismatch"

    print("KERNEL_OK")
</pallas_src>

<mosaic_0001>
module attributes {stable_mosaic.version = 11 : i64} {
  func.func @_stats_kernel(%arg0: i32, %arg1: i32, %arg2: memref<8x256xf32, #tpu.memory_space<vmem>>, %arg3: memref<8x1xf32, #tpu.memory_space<vmem>>, %arg4: memref<2x8x128xf32, #tpu.memory_space<vmem>>) attributes {dimension_semantics = [#tpu.dimension_semantics<parallel>, #tpu.dimension_semantics<arbitrary>], iteration_bounds = array<i64: 1, 1>, scalar_prefetch = 0 : i64, scratch_operands = 0 : i64, tpu.core_type = #tpu.core_type<tc>, window_params = [{transform_indices = @transform_0, window_bounds = array<i64: 8, 256>}, {transform_indices = @transform_1, window_bounds = array<i64: 8, 1>}, {transform_indices = @transform_2, window_bounds = array<i64: 2, 8, 128>}]} {
    %c0_i32 = arith.constant 0 : i32
    %0 = arith.cmpi eq, %arg1, %c0_i32 : i32
    %1 = arith.extui %0 : i1 to i32
    %c0_i32_0 = arith.constant 0 : i32
    %2 = arith.cmpi ne, %1, %c0_i32_0 : i32
    scf.if %2 {
      %cst_17 = arith.constant 0.000000e+00 : f32
      %30 = vector.broadcast %cst_17 : f32 to vector<2x8x128xf32>
      %c0_18 = arith.constant 0 : index
      %c0_19 = arith.constant 0 : index
      %c0_20 = arith.constant 0 : index
      %31 = vector.load %arg4[%c0_18, %c0_19, %c0_20] : memref<2x8x128xf32, #tpu.memory_space<vmem>>, vector<2x8x128xf32>
      tpu.vector_store %arg4[%c0_18, %c0_19, %c0_20], %30 {strides = array<i32>} : memref<2x8x128xf32, #tpu.memory_space<vmem>>, vector<2x8x128xf32>,
    } else {
    }
    %c0 = arith.constant 0 : index
    %c0_1 = arith.constant 0 : index
    %3 = vector.load %arg3[%c0, %c0_1] : memref<8x1xf32, #tpu.memory_space<vmem>>, vector<8x1xf32>
    %4 = vector.shape_cast %3 : vector<8x1xf32> to vector<8x1xf32>
    %5 = vector.broadcast %4 : vector<8x1xf32> to vector<8x128xf32>
    %cst = arith.constant 0.000000e+00 : f32
    %6 = vector.broadcast %cst : f32 to vector<8x128xf32>
    %cst_2 = arith.constant 0.000000e+00 : f32
    %7 = vector.broadcast %cst_2 : f32 to vector<8x128xf32>
    %c0_3 = arith.constant 0 : index
    %c0_4 = arith.constant 0 : index
    %8 = vector.load %arg2[%c0_3, %c0_4] : memref<8x256xf32, #tpu.memory_space<vmem>>, vector<8x128xf32>
    %9 = arith.subf %8, %5 : vector<8x128xf32>
    %10 = arith.addf %6, %9 : vector<8x128xf32>
    %11 = arith.mulf %9, %9 : vector<8x128xf32>
    %12 = arith.addf %7, %11 : vector<8x128xf32>
    %c0_5 = arith.constant 0 : index
    %c128 = arith.constant 128 : index
    %13 = vector.load %arg2[%c0_5, %c128] : memref<8x256xf32, #tpu.memory_space<vmem>>, vector<8x128xf32>
    %14 = arith.subf %13, %5 : vector<8x128xf32>
    %15 = arith.addf %10, %14 : vector<8x128xf32>
    %16 = arith.mulf %14, %14 : vector<8x128xf32>
    %17 = arith.addf %12, %16 : vector<8x128xf32>
    %c0_6 = arith.constant 0 : index
    %c0_7 = arith.constant 0 : index
    %c0_8 = arith.constant 0 : index
    %18 = vector.load %arg4[%c0_6, %c0_7, %c0_8] : memref<2x8x128xf32, #tpu.memory_space<vmem>>, vector<1x8x128xf32>
    %19 = vector.shape_cast %18 : vector<1x8x128xf32> to vector<8x128xf32>
    %20 = arith.addf %19, %15 : vector<8x128xf32>
    %c0_9 = arith.constant 0 : index
    %c0_10 = arith.constant 0 : index
    %c0_11 = arith.constant 0 : index
    %21 = vector.load %arg4[%c0_9, %c0_10, %c0_11] : memref<2x8x128xf32, #tpu.memory_space<vmem>>, vector<1x8x128xf32>
    %22 = vector.shape_cast %21 : vector<1x8x128xf32> to vector<8x128xf32>
    %23 = vector.shape_cast %20 : vector<8x128xf32> to vector<1x8x128xf32>
    tpu.vector_store %arg4[%c0_9, %c0_10, %c0_11], %23 {strides = array<i32>} : memref<2x8x128xf32, #tpu.memory_space<vmem>>, vector<1x8x128xf32>,
    %c1 = arith.constant 1 : index
    %c0_12 = arith.constant 0 : index
    %c0_13 = arith.constant 0 : index
    %24 = vector.load %arg4[%c1, %c0_12, %c0_13] : memref<2x8x128xf32, #tpu.memory_space<vmem>>, vector<1x8x128xf32>
    %25 = vector.shape_cast %24 : vector<1x8x128xf32> to vector<8x128xf32>
    %26 = arith.addf %25, %17 : vector<8x128xf32>
    %c1_14 = arith.constant 1 : index
    %c0_15 = arith.constant 0 : index
    %c0_16 = arith.constant 0 : index
    %27 = vector.load %arg4[%c1_14, %c0_15, %c0_16] : memref<2x8x128xf32, #tpu.memory_space<vmem>>, vector<1x8x128xf32>
    %28 = vector.shape_cast %27 : vector<1x8x128xf32> to vector<8x128xf32>
    %29 = vector.shape_cast %26 : vector<8x128xf32> to vector<1x8x128xf32>
    tpu.vector_store %arg4[%c1_14, %c0_15, %c0_16], %29 {strides = array<i32>} : memref<2x8x128xf32, #tpu.memory_space<vmem>>, vector<1x8x128xf32>,
    return
  }
  func.func @transform_0(%arg0: i32, %arg1: i32) -> (i32, i32) {
    %c0_i32 = arith.constant 0 : i32
    return %arg0, %arg1 : i32, i32
  }
  func.func @transform_1(%arg0: i32, %arg1: i32) -> (i32, i32) {
    %c0_i32 = arith.constant 0 : i32
    %c0_i32_0 = arith.constant 0 : i32
    return %arg0, %c0_i32 : i32, i32
  }
  func.func @transform_2(%arg0: i32, %arg1: i32) -> (i32, i32, i32) {
    %c0_i32 = arith.constant 0 : i32
    %c0_i32_0 = arith.constant 0 : i32
    %c0_i32_1 = arith.constant 0 : i32
    return %c0_i32, %arg0, %c0_i32_0 : i32, i32, i32
  }
}

module attributes {stable_mosaic.version = 11 : i64} {
  func.func @_norm_kernel(%arg0: i32, %arg1: i32, %arg2: memref<8x256xf32, #tpu.memory_space<vmem>>, %arg3: memref<8x2xf32, #tpu.memory_space<vmem>>, %arg4: memref<8x256xf32, #tpu.memory_space<vmem>>) attributes {dimension_semantics = [#tpu.dimension_semantics<parallel>, #tpu.dimension_semantics<parallel>], iteration_bounds = array<i64: 1, 1>, scalar_prefetch = 0 : i64, scratch_operands = 0 : i64, tpu.core_type = #tpu.core_type<tc>, window_params = [{transform_indices = @transform_0, window_bounds = array<i64: 8, 256>}, {transform_indices = @transform_1, window_bounds = array<i64: 8, 2>}, {transform_indices = @transform_2, window_bounds = array<i64: 8, 256>}]} {
    %c0 = arith.constant 0 : index
    %c0_0 = arith.constant 0 : index
    %0 = vector.load %arg3[%c0, %c0_0] : memref<8x2xf32, #tpu.memory_space<vmem>>, vector<8x2xf32>
    %1 = vector.extract_strided_slice %0 {offsets = [0, 0], sizes = [8, 1], strides = [1, 1]} : vector<8x2xf32> to vector<8x1xf32>
    %2 = vector.extract_strided_slice %0 {offsets = [0, 1], sizes = [8, 1], strides = [1, 1]} : vector<8x2xf32> to vector<8x1xf32>
    %c0_1 = arith.constant 0 : index
    %c0_2 = arith.constant 0 : index
    %3 = vector.load %arg2[%c0_1, %c0_2] : memref<8x256xf32, #tpu.memory_space<vmem>>, vector<8x256xf32>
    %4 = vector.broadcast %1 : vector<8x1xf32> to vector<8x256xf32>
    %5 = arith.mulf %3, %4 : vector<8x256xf32>
    %6 = vector.broadcast %2 : vector<8x1xf32> to vector<8x256xf32>
    %7 = arith.addf %5, %6 : vector<8x256xf32>
    %c0_3 = arith.constant 0 : index
    %c0_4 = arith.constant 0 : index
    %8 = vector.load %arg4[%c0_3, %c0_4] : memref<8x256xf32, #tpu.memory_space<vmem>>, vector<8x256xf32>
    tpu.vector_store %arg4[%c0_3, %c0_4], %7 {strides = array<i32>} : memref<8x256xf32, #tpu.memory_space<vmem>>, vector<8x256xf32>,
    return
  }
  func.func @transform_0(%arg0: i32, %arg1: i32) -> (i32, i32) {
    %c0_i32 = arith.constant 0 : i32
    return %arg0, %arg1 : i32, i32
  }
  func.func @transform_1(%arg0: i32, %arg1: i32) -> (i32, i32) {
    %c0_i32 = arith.constant 0 : i32
    %c0_i32_0 = arith.constant 0 : i32
    return %arg0, %c0_i32 : i32, i32
  }
  func.func @transform_2(%arg0: i32, %arg1: i32) -> (i32, i32) {
    %c0_i32 = arith.constant 0 : i32
    return %arg0, %arg1 : i32, i32
  }
}

</mosaic_0001>

<bundles_post_ra>
// kernel: tile.0
= control target key start
LH: loop header
LB: loop body
LE: loop exit
PB: predicated region body
PF: predicated region fallthrough
CT: control target
= control target key end

     0   :  { %s34_s8 = smov 125   ;;  %s35_s9 = smov 126   ;;  %vm7_vm0 = vcmask 7168   ;;  %s61_s0 = inlined_call_operand.vmem [shape: f32[2,4], index: 0, kind: input, shape index: {}]   ;;  %s62_s1 = inlined_call_operand.vmem [shape: f32[8,1], index: 1, kind: output, shape index: {}]  }
   0x1   :  { %v4_v0 = vld [vmem:[%s61_s0] sm:$0x3]  ;;  %s33_s0 = smov 127  }
   0x2   :  { %5 = vst [vmem:[#allocation0] sm:$0x3] %v4_v0 }
   0x9   :  { %v9_v1 = vld [vmem:[#allocation0] sm:$0x3]  }
   0xa   :  { %v21_v2 = vld [vmem:[#allocation0] sm:$0x3]   ;;  %10 = vrot.lane.b32.xlu0 %v9_v1, %s33_s0 }
   0xb   :  { %22 = vrot.lane.b32.xlu1 %v21_v2, %s34_s8  ;;  %v15_v3 = vld [vmem:[#allocation0] sm:$0x3]  }
   0xc   :  { %v6_v4 = vld [vmem:[#allocation0] sm:$0x3]  }
   0xd   :  { %8 = vst.msk [vmem:[%s62_s1] ss:$4 sm:$0x3] %vm7_vm0, %v6_v4  }
  0x12   :  { %16 = vrot.lane.b32.xlu0 %v15_v3, %s35_s9 }
  0x7c   :  { %v11_v5 = vpop.permute.xlu0 %10  }
  0x7d   :  { %v23_v6 = vpop.permute.xlu1 %22   ;;  %27 = vst.msk [vmem:[%s62_s1 + $0x1] ss:$4 sm:$0x3] %vm7_vm0, %v11_v5  }
  0x7e   :  { %29 = vst.msk [vmem:[%s62_s1 + $0x3] ss:$4 sm:$0x3] %vm7_vm0, %v23_v6  }
  0x84   :  { %v17_v7 = vpop.permute.xlu0 %16  }
  0x85   :  { %28 = vst.msk [vmem:[%s62_s1 + $0x2] ss:$4 sm:$0x3] %vm7_vm0, %v17_v7  }

// kernel: tile.18
= control target key start
LH: loop header
LB: loop body
LE: loop exit
PB: predicated region body
PF: predicated region fallthrough
CT: control target
= control target key end

     0   :  { %s22_s0 = inlined_call_operand.vmem [shape: f32[4], index: 0, kind: input, shape index: {}]   ;;  %s23_s1 = inlined_call_operand.vmem [shape: f32[2,4], index: 1, kind: output, shape index: {}]  }
   0x1   :  { %v4_v0 = vld [vmem:[%s22_s0] ss:$0 sm:$0xff] }
   0x2   :  { %5 = vst [vmem:[%s23_s1] sm:$0x3] %v4_v0 }

// kernel: tile.29
= control target key start
LH: loop header
LB: loop body
LE: loop exit
PB: predicated region body
PF: predicated region fallthrough
CT: control target
= control target key end

     0   :  { %vm7_vm0 = vcmask 31744   ;;  %vm13_vm1 = vcmask 64544   ;;  %s39_s0 = inlined_call_operand.vmem [shape: f32[2,4], index: 0, kind: input, shape index: {}]   ;;  %s40_s1 = inlined_call_operand.vmem [shape: f32[8,1], index: 1, kind: output, shape index: {}]  }
   0x1   :  { %v4_v0 = vld [vmem:[%s39_s0] sm:$0x3]  ;;  %s22_s0 = smov 4  }
   0x2   :  { %5 = vst [vmem:[#allocation1] sm:$0x3] %v4_v0 }
   0x9   :  { %v10_v1 = vld [vmem:[#allocation1 + $0x1] sm:$0x1]   ;;  %v6_v2 = vld [vmem:[#allocation1] sm:$0x1]  }
   0xa   :  { %11 = vrot.lane.b32.xlu0 %v10_v1, %s22_s0  ;;  %8 = vst.msk [vmem:[#allocation0] sm:$0x1] %vm7_vm0, %v6_v2  }
  0x7c   :  { %v12_v3 = vpop.permute.xlu0 %11  }
  0x7d   :  { %14 = vst.msk [vmem:[#allocation0] sm:$0x1] %vm13_vm1, %v12_v3  }
  0x84   :  { %v17_v4 = vld [vmem:[#allocation0] sm:$0x1] }
  0x85   :  { %20 = vst [vmem:[%s40_s1] sm:$0x1] %v17_v4 }

// kernel: ema_batchnorm2d.2
= control target key start
LH: loop header
LB: loop body
LE: loop exit
PB: predicated region body
PF: predicated region fallthrough
CT: control target
= control target key end

     0   :  { %v49_v0 = vmov 0   ;;  %s80_s1 = inlined_call_operand.vmem [shape: f32[8,1], index: 1, kind: input, shape index: {}]   ;;  %s81_s0 = inlined_call_operand.vmem [shape: f32[8,256], index: 0, kind: input, shape index: {}]   ;;  %s82_s2 = inlined_call_operand.vmem [shape: f32[2,8,128], index: 2, kind: output, shape index: {}]  }
   0x1   :  { %48 = vset.pattern.permute.xlu0 %v49_v0  ;;  %v17_v1 = vld [vmem:[%s80_s1] sm:$0xff]  ;;  %v28_v3 = vld [vmem:[%s81_s0 + $0x8] sm:$0xff] }
   0x2   :  { %20 = vperm.xlu0 %48, %v17_v1   ;;  %v23_v2 = vld [vmem:[%s81_s0] sm:$0xff] }
  0x74   :  { %v21_v4 = vpop.permute.xlu0 %20 }
  0x75   :  { %v24_v5 = vsub.f32 %v23_v2, %v21_v4  ;;  %v29_v6 = vsub.f32 %v28_v3, %v21_v4 }
  0x77   :  { %v26_v7 = vmul.f32 %v24_v5, %v24_v5  ;;  %v30_v8 = vadd.f32 %v29_v6, %v24_v5  ;;  %v31_v9 = vmul.f32 %v29_v6, %v29_v6 }
  0x79   :  { %v32_v10 = vadd.f32 %v31_v9, %v26_v7  ;;  %35 = vst [vmem:[%s82_s2] sm:$0xff] %v30_v8 }
  0x7b   :  { %45 = vst [vmem:[%s82_s2 + $0x8] sm:$0xff] %v32_v10 }

// kernel: ema_batchnorm2d.3
= control target key start
LH: loop header
LB: loop body
LE: loop exit
PB: predicated region body
PF: predicated region fallthrough
CT: control target
= control target key end

     0   :  { %v37_v0 = vmov 0   ;;  %v38_v2 = vmov 1   ;;  %s69_s1 = inlined_call_operand.vmem [shape: f32[8,2], index: 1, kind: input, shape index: {}]   ;;  %s70_s0 = inlined_call_operand.vmem [shape: f32[8,256], index: 0, kind: input, shape index: {}]   ;;  %s71_s2 = inlined_call_operand.vmem [shape: f32[8,256], index: 2, kind: output, shape index: {}]  }
   0x1   :  { %35 = vset.pattern.permute.xlu0 %v37_v0  ;;  %v11_v1 = vld [vmem:[%s69_s1] sm:$0xff]  ;;  %v13_v5 = vld [vmem:[%s70_s0 + $0x8] sm:$0xff] }
   0x2   :  { %16 = vperm.xlu0 %35, %v11_v1   ;;  %v12_v4 = vld [vmem:[%s70_s0] sm:$0xff] }
   0xa   :  { %36 = vset.pattern.permute.xlu0 %v38_v2 }
   0xb   :  { %22 = vperm.xlu0 %36, %v11_v1  }
  0x74   :  { %v17_v3 = vpop.permute.xlu0 %16 }
  0x75   :  { %v19_v6 = vmul.f32 %v17_v3, %v12_v4  ;;  %v20_v7 = vmul.f32 %v17_v3, %v13_v5 }
  0x7d   :  { %v23_v8 = vpop.permute.xlu0 %22 }
  0x7e   :  { %v25_v9 = vadd.f32 %v23_v8, %v19_v6  ;;  %v26_v10 = vadd.f32 %v23_v8, %v20_v7 }
  0x80   :  { %27 = vst [vmem:[%s71_s2] sm:$0xff] %v25_v9 }
  0x81   :  { %28 = vst [vmem:[%s71_s2 + $0x8] sm:$0xff] %v26_v10 }

</bundles_post_ra>
